<compile_context>
chip_gen: v5e
topology: v5e:2x2
jax: 0.10.0
libtpu: 0.0.40
codegen_flags: <defaults>
</compile_context>

<pallas_src>
import functools

import jax
import jax.numpy as jnp
from jax.experimental import pallas as pl
from jax.experimental.pallas import tpu as pltpu


def _round_up(x, m):
    return ((x + m - 1) // m) * m


def _embeddings_kernel(s_ref, a_ref, r_ref, w_ref, out_ref, *,
                       B, K, o_dim, a_pad, r_pad, ar_off, pos_off,
                       g_off, b_off, eps):
    # s_ref  : (B*K, o_dim) f32   raw states, rows in (batch, timestep) order
    # a_ref  : (B*K, 1)     i32   action ids
    # r_ref  : (B*K, 1)     i32   return-to-go ids
    # w_ref  : packed params (rows, d_model):
    #          [0:o_dim)                 state Linear W^T
    #          [ar_off:ar_off+a_pad+r_pad) action table | returns table (8-aligned)
    #          [pos_off:pos_off+2BK)     positional embedding tiled 2B times
    #          [g_off] / [b_off]         LayerNorm gamma / beta
    # out_ref: (3*B*K, d_model) f32, rows in (batch, modality, timestep) order
    BK = B * K
    F_ar = a_pad + r_pad

    # ---- static ref-slice views of the packed parameter table (zero-cost) ----
    w_s = w_ref[0:o_dim, :]                         # (o_dim, d)
    w_ar = w_ref[ar_off:ar_off + F_ar, :]           # (a_pad + r_pad, d)
    pos_s = w_ref[pos_off:pos_off + BK, :]          # (BK, d)   pos tiled B x
    pos_ar = w_ref[pos_off:pos_off + 2 * BK, :]     # (2BK, d)  pos tiled 2B x
    gamma = w_ref[g_off:g_off + 1, :]               # (1, d)
    beta = w_ref[b_off:b_off + 1, :]                # (1, d)

    # ---- states: one small MXU matmul ----
    e_s = jnp.dot(s_ref[...], w_s, preferred_element_type=jnp.float32)    # (BK, d)

    # ---- actions / returns: in-kernel one-hots + one fused MXU matmul ----
    ids = jnp.concatenate([a_ref[...], r_ref[...] + a_pad], axis=0)       # (2BK, 1)
    col = jax.lax.broadcasted_iota(jnp.int32, (2 * BK, F_ar), 1)
    one_hot = (col == ids).astype(jnp.float32)                            # (2BK, F_ar)
    e_ar = jnp.dot(one_hot, w_ar, preferred_element_type=jnp.float32)     # (2BK, d)

    # ---- fused pos-add + LayerNorm, strictly 2D (no in-kernel reshapes) ----
    def ln(e):
        mu = jnp.mean(e, axis=-1, keepdims=True)
        var = jnp.mean(jnp.square(e - mu), axis=-1, keepdims=True)
        return (e - mu) * jax.lax.rsqrt(var + eps) * gamma + beta

    y_s = ln(e_s + pos_s)        # (BK, d)  states
    y_ar = ln(e_ar + pos_ar)     # (2BK, d) actions rows [0:BK), returns rows [BK:2BK)

    # ---- store in torch stack(dim=1)+flatten row order (b, modality, k) ----
    # Static unroll over B; every store is K=8 rows at an 8-aligned offset.
    for b in range(B):
        base = b * 3 * K
        out_ref[base:base + K, :] = y_s[b * K:(b + 1) * K, :]
        out_ref[base + K:base + 2 * K, :] = y_ar[b * K:(b + 1) * K, :]
        out_ref[base + 2 * K:base + 3 * K, :] = y_ar[BK + b * K:BK + (b + 1) * K, :]


def pack_params(params, o_dim, num_actions, num_returns, K, B):
    """One-time parameter packing (transpose + pad + pos pre-tile) -> one table."""
    d_model = params["state_emb_w"].shape[0]
    o_pad = _round_up(o_dim, 8)
    a_pad = _round_up(num_actions, 8)
    r_pad = _round_up(num_returns, 8)
    pos_rows = _round_up(2 * B * K, 8)

    def padrows(x, n):
        x = x.astype(jnp.float32)
        return jnp.pad(x, ((0, n - x.shape[0]), (0, 0)))

    pos_tiled = jnp.tile(params["pos_emb"].astype(jnp.float32), (2 * B, 1))  # (2BK, d)

    table = jnp.concatenate([
        padrows(params["state_emb_w"].T, o_pad),     # state Linear W^T (transposed once)
        padrows(params["action_table"], a_pad),
        padrows(params["returns_table"], r_pad),
        padrows(pos_tiled, pos_rows),
        padrows(params["ln_gamma"].reshape(1, d_model), 8),
        padrows(params["ln_beta"].reshape(1, d_model), 8),
    ], axis=0)

    layout = dict(
        o_dim=o_dim, o_pad=o_pad, a_pad=a_pad, r_pad=r_pad,
        ar_off=o_pad,
        pos_off=o_pad + a_pad + r_pad,
        g_off=o_pad + a_pad + r_pad + pos_rows,
        b_off=o_pad + a_pad + r_pad + pos_rows + 8,
    )
    return table, layout


def embeddings_forward(states, actions, returns2go, packed_table, layout):
    """Pallas forward pass of the Embeddings module (inference: dropout = identity)."""
    B, K, o_dim = states.shape
    d_model = packed_table.shape[1]

    # Metadata-only host reshapes (contiguous): no padded slabs, no fp32 one-hots.
    states2d = states.reshape(B * K, o_dim).astype(jnp.float32)
    a_ids = actions.reshape(B * K, 1).astype(jnp.int32)
    r_ids = returns2go.reshape(B * K, 1).astype(jnp.int32)

    kernel = functools.partial(
        _embeddings_kernel, B=B, K=K, o_dim=o_dim,
        a_pad=layout["a_pad"], r_pad=layout["r_pad"], ar_off=layout["ar_off"],
        pos_off=layout["pos_off"], g_off=layout["g_off"], b_off=layout["b_off"],
        eps=1e-5)

    out2d = pl.pallas_call(
        kernel,
        out_shape=jax.ShapeDtypeStruct((3 * B * K, d_model), jnp.float32),
        in_specs=[
            pl.BlockSpec(memory_space=pltpu.MemorySpace.VMEM),   # states (B*K, o_dim)
            pl.BlockSpec(memory_space=pltpu.MemorySpace.VMEM),   # action ids
            pl.BlockSpec(memory_space=pltpu.MemorySpace.VMEM),   # return ids
            pl.BlockSpec(memory_space=pltpu.MemorySpace.VMEM),   # packed params (1 DMA)
        ],
        out_specs=pl.BlockSpec(memory_space=pltpu.MemorySpace.VMEM),
    )(states2d, a_ids, r_ids, packed_table)

    # Contiguous, metadata-only reshape to the (B, 3K, d_model) trajectory layout.
    return out2d.reshape(B, 3 * K, d_model)


def embeddings_reference(states, actions, returns2go, params):
    """Pure-JAX reference matching the PyTorch forward (eval mode)."""
    d_model = params["state_emb_w"].shape[0]
    s_emb = jnp.einsum("bko,do->bkd", states, params["state_emb_w"])
    a_emb = params["action_table"][actions]
    r_emb = params["returns_table"][returns2go]
    pos = params["pos_emb"][None]

    def ln(x):
        mu = jnp.mean(x, axis=-1, keepdims=True)
        var = jnp.mean((x - mu) ** 2, axis=-1, keepdims=True)
        xn = (x - mu) / jnp.sqrt(var + 1e-5)
        return xn * params["ln_gamma"] + params["ln_beta"]

    s = ln(s_emb + pos)
    a = ln(a_emb + pos)
    r = ln(r_emb + pos)
    traj = jnp.stack((s, a, r), axis=1)                      # (B, 3, K, d)
    return traj.reshape(traj.shape[0], -1, d_model)          # (B, 3K, d)


if __name__ == "__main__":
    # Module hyperparameters (CartPole-ish, small)
    d_model = 32
    K = 8             # context length
    o_dim = 4         # CartPole observation dim
    a_dim = 1         # unused in forward
    num_actions = 2
    max_return = 16
    dropout = 0.1     # identity at inference
    B = 2

    key = jax.random.PRNGKey(0)
    ks = jax.random.split(key, 8)

    params = {
        "state_emb_w": jax.random.normal(ks[0], (d_model, o_dim), jnp.float32) * 0.1,
        "action_table": jax.random.normal(ks[1], (num_actions, d_model), jnp.float32),
        "returns_table": jax.random.normal(ks[2], (max_return + 1, d_model), jnp.float32),
        "pos_emb": jax.random.normal(ks[3], (K, d_model), jnp.float32),
        "ln_gamma": jnp.ones((d_model,), jnp.float32),
        "ln_beta": jnp.zeros((d_model,), jnp.float32),
    }

    states = jax.random.normal(ks[4], (B, K, o_dim), jnp.float32)
    actions = jax.random.randint(ks[5], (B, K), 0, num_actions, jnp.int32)
    returns2go = jax.random.randint(ks[6], (B, K), 0, max_return + 1, jnp.int32)

    # Parameter packing / transpose / pos pre-tiling done once at "load time".
    packed_table, layout = pack_params(params, o_dim, num_actions, max_return + 1, K, B)

    out = embeddings_forward(states, actions, returns2go, packed_table, layout)
    out = jax.block_until_ready(out)

    ref = embeddings_reference(states, actions, returns2go, params)
    assert out.shape == (B, 3 * K, d_model), out.shape
    assert jnp.allclose(out, ref, atol=1e-4, rtol=1e-4), float(jnp.max(jnp.abs(out - ref)))

    print("KERNEL_OK")
</pallas_src>

<mosaic_0001>
module attributes {stable_mosaic.version = 11 : i64} {
  func.func @_embeddings_kernel(%arg0: memref<16x4xf32, #tpu.memory_space<vmem>>, %arg1: memref<16x1xi32, #tpu.memory_space<vmem>>, %arg2: memref<16x1xi32, #tpu.memory_space<vmem>>, %arg3: memref<88x32xf32, #tpu.memory_space<vmem>>, %arg4: memref<48x32xf32, #tpu.memory_space<vmem>>) attributes {dimension_semantics = [], scalar_prefetch = 0 : i64, scratch_operands = 0 : i64, tpu.core_type = #tpu.core_type<tc>} {
    %c0 = arith.constant 0 : index
    %c0_0 = arith.constant 0 : index
    %0 = vector.load %arg3[%c0, %c0_0] : memref<88x32xf32, #tpu.memory_space<vmem>>, vector<4x32xf32>
    %c8 = arith.constant 8 : index
    %c0_1 = arith.constant 0 : index
    %1 = vector.load %arg3[%c8, %c0_1] : memref<88x32xf32, #tpu.memory_space<vmem>>, vector<32x32xf32>
    %c40 = arith.constant 40 : index
    %c0_2 = arith.constant 0 : index
    %2 = vector.load %arg3[%c40, %c0_2] : memref<88x32xf32, #tpu.memory_space<vmem>>, vector<16x32xf32>
    %c40_3 = arith.constant 40 : index
    %c0_4 = arith.constant 0 : index
    %3 = vector.load %arg3[%c40_3, %c0_4] : memref<88x32xf32, #tpu.memory_space<vmem>>, vector<32x32xf32>
    %c72 = arith.constant 72 : index
    %c0_5 = arith.constant 0 : index
    %4 = vector.load %arg3[%c72, %c0_5] : memref<88x32xf32, #tpu.memory_space<vmem>>, vector<1x32xf32>
    %c80 = arith.constant 80 : index
    %c0_6 = arith.constant 0 : index
    %5 = vector.load %arg3[%c80, %c0_6] : memref<88x32xf32, #tpu.memory_space<vmem>>, vector<1x32xf32>
    %c0_7 = arith.constant 0 : index
    %c0_8 = arith.constant 0 : index
    %6 = vector.load %arg0[%c0_7, %c0_8] : memref<16x4xf32, #tpu.memory_space<vmem>>, vector<16x4xf32>
    %cst = arith.constant dense<0.000000e+00> : vector<16x32xf32>
    %7 = tpu.matmul %6, %0, %cst {dimension_numbers = #tpu.dot_dimension_numbers<[1], [0], [0], [1], [0, 0, 1, 1], [], []>} : vector<16x4xf32>, vector<4x32xf32>, vector<16x32xf32> -> vector<16x32xf32>
    %c0_9 = arith.constant 0 : index
    %c0_10 = arith.constant 0 : index
    %8 = vector.load %arg1[%c0_9, %c0_10] : memref<16x1xi32, #tpu.memory_space<vmem>>, vector<16x1xi32>
    %c0_11 = arith.constant 0 : index
    %c0_12 = arith.constant 0 : index
    %9 = vector.load %arg2[%c0_11, %c0_12] : memref<16x1xi32, #tpu.memory_space<vmem>>, vector<16x1xi32>
    %c8_i32 = arith.constant 8 : i32
    %10 = vector.broadcast %c8_i32 : i32 to vector<16x1xi32>
    %11 = arith.addi %9, %10 : vector<16x1xi32>
    %12 = tpu.concatenate %8, %11 in 0 : vector<16x1xi32>, vector<16x1xi32> -> vector<32x1xi32>
    %13 = tpu.iota {dimensions = array<i32: 1>} : vector<32x32xi32>
    %14 = vector.broadcast %12 : vector<32x1xi32> to vector<32x32xi32>
    %15 = arith.cmpi eq, %13, %14 : vector<32x32xi32>
    %16 = arith.extui %15 : vector<32x32xi1> to vector<32x32xi32>
    %17 = arith.sitofp %16 : vector<32x32xi32> to vector<32x32xf32>
    %cst_13 = arith.constant dense<0.000000e+00> : vector<32x32xf32>
    %18 = tpu.matmul %17, %1, %cst_13 {dimension_numbers = #tpu.dot_dimension_numbers<[1], [0], [0], [1], [0, 0, 1, 1], [], []>} : vector<32x32xf32>, vector<32x32xf32>, vector<32x32xf32> -> vector<32x32xf32>
    %19 = arith.addf %7, %2 : vector<16x32xf32>
    %cst_14 = arith.constant dense<0.000000e+00> : vector<16xf32>
    %20 = vector.multi_reduction <add>, %19, %cst_14 [1] : vector<16x32xf32> to vector<16xf32>
    %21 = vector.shape_cast %20 : vector<16xf32> to vector<16x1xf32>
    %cst_15 = arith.constant 3.200000e+01 : f32
    %22 = vector.broadcast %cst_15 : f32 to vector<16x1xf32>
    %23 = arith.divf %21, %22 : vector<16x1xf32>
    %24 = vector.broadcast %23 : vector<16x1xf32> to vector<16x32xf32>
    %25 = arith.subf %19, %24 : vector<16x32xf32>
    %26 = arith.mulf %25, %25 : vector<16x32xf32>
    %cst_16 = arith.constant dense<0.000000e+00> : vector<16xf32>
    %27 = vector.multi_reduction <add>, %26, %cst_16 [1] : vector<16x32xf32> to vector<16xf32>
    %28 = vector.shape_cast %27 : vector<16xf32> to vector<16x1xf32>
    %cst_17 = arith.constant 3.200000e+01 : f32
    %29 = vector.broadcast %cst_17 : f32 to vector<16x1xf32>
    %30 = arith.divf %28, %29 : vector<16x1xf32>
    %31 = vector.broadcast %23 : vector<16x1xf32> to vector<16x32xf32>
    %32 = arith.subf %19, %31 : vector<16x32xf32>
    %cst_18 = arith.constant 9.99999974E-6 : f32
    %33 = vector.broadcast %cst_18 : f32 to vector<16x1xf32>
    %34 = arith.addf %30, %33 : vector<16x1xf32>
    %35 = math.rsqrt %34 : vector<16x1xf32>
    %36 = vector.broadcast %35 : vector<16x1xf32> to vector<16x32xf32>
    %37 = arith.mulf %32, %36 : vector<16x32xf32>
    %38 = vector.broadcast %4 : vector<1x32xf32> to vector<16x32xf32>
    %39 = arith.mulf %37, %38 : vector<16x32xf32>
    %40 = vector.broadcast %5 : vector<1x32xf32> to vector<16x32xf32>
    %41 = arith.addf %39, %40 : vector<16x32xf32>
    %42 = arith.addf %18, %3 : vector<32x32xf32>
    %cst_19 = arith.constant dense<0.000000e+00> : vector<32xf32>
    %43 = vector.multi_reduction <add>, %42, %cst_19 [1] : vector<32x32xf32> to vector<32xf32>
    %44 = vector.shape_cast %43 : vector<32xf32> to vector<32x1xf32>
    %cst_20 = arith.constant 3.200000e+01 : f32
    %45 = vector.broadcast %cst_20 : f32 to vector<32x1xf32>
    %46 = arith.divf %44, %45 : vector<32x1xf32>
    %47 = vector.broadcast %46 : vector<32x1xf32> to vector<32x32xf32>
    %48 = arith.subf %42, %47 : vector<32x32xf32>
    %49 = arith.mulf %48, %48 : vector<32x32xf32>
    %cst_21 = arith.constant dense<0.000000e+00> : vector<32xf32>
    %50 = vector.multi_reduction <add>, %49, %cst_21 [1] : vector<32x32xf32> to vector<32xf32>
    %51 = vector.shape_cast %50 : vector<32xf32> to vector<32x1xf32>
    %cst_22 = arith.constant 3.200000e+01 : f32
    %52 = vector.broadcast %cst_22 : f32 to vector<32x1xf32>
    %53 = arith.divf %51, %52 : vector<32x1xf32>
    %54 = vector.broadcast %46 : vector<32x1xf32> to vector<32x32xf32>
    %55 = arith.subf %42, %54 : vector<32x32xf32>
    %cst_23 = arith.constant 9.99999974E-6 : f32
    %56 = vector.broadcast %cst_23 : f32 to vector<32x1xf32>
    %57 = arith.addf %53, %56 : vector<32x1xf32>
    %58 = math.rsqrt %57 : vector<32x1xf32>
    %59 = vector.broadcast %58 : vector<32x1xf32> to vector<32x32xf32>
    %60 = arith.mulf %55, %59 : vector<32x32xf32>
    %61 = vector.broadcast %4 : vector<1x32xf32> to vector<32x32xf32>
    %62 = arith.mulf %60, %61 : vector<32x32xf32>
    %63 = vector.broadcast %5 : vector<1x32xf32> to vector<32x32xf32>
    %64 = arith.addf %62, %63 : vector<32x32xf32>
    %65 = vector.extract_strided_slice %41 {offsets = [0, 0], sizes = [8, 32], strides = [1, 1]} : vector<16x32xf32> to vector<8x32xf32>
    %c0_24 = arith.constant 0 : index
    %c0_25 = arith.constant 0 : index
    %66 = vector.load %arg4[%c0_24, %c0_25] : memref<48x32xf32, #tpu.memory_space<vmem>>, vector<8x32xf32>
    tpu.vector_store %arg4[%c0_24, %c0_25], %65 {strides = array<i32>} : memref<48x32xf32, #tpu.memory_space<vmem>>, vector<8x32xf32>,
    %67 = vector.extract_strided_slice %64 {offsets = [0, 0], sizes = [8, 32], strides = [1, 1]} : vector<32x32xf32> to vector<8x32xf32>
    %c8_26 = arith.constant 8 : index
    %c0_27 = arith.constant 0 : index
    %68 = vector.load %arg4[%c8_26, %c0_27] : memref<48x32xf32, #tpu.memory_space<vmem>>, vector<8x32xf32>
    tpu.vector_store %arg4[%c8_26, %c0_27], %67 {strides = array<i32>} : memref<48x32xf32, #tpu.memory_space<vmem>>, vector<8x32xf32>,
    %69 = vector.extract_strided_slice %64 {offsets = [16, 0], sizes = [8, 32], strides = [1, 1]} : vector<32x32xf32> to vector<8x32xf32>
    %c16 = arith.constant 16 : index
    %c0_28 = arith.constant 0 : index
    %70 = vector.load %arg4[%c16, %c0_28] : memref<48x32xf32, #tpu.memory_space<vmem>>, vector<8x32xf32>
    tpu.vector_store %arg4[%c16, %c0_28], %69 {strides = array<i32>} : memref<48x32xf32, #tpu.memory_space<vmem>>, vector<8x32xf32>,
    %71 = vector.extract_strided_slice %41 {offsets = [8, 0], sizes = [8, 32], strides = [1, 1]} : vector<16x32xf32> to vector<8x32xf32>
    %c24 = arith.constant 24 : index
    %c0_29 = arith.constant 0 : index
    %72 = vector.load %arg4[%c24, %c0_29] : memref<48x32xf32, #tpu.memory_space<vmem>>, vector<8x32xf32>
    tpu.vector_store %arg4[%c24, %c0_29], %71 {strides = array<i32>} : memref<48x32xf32, #tpu.memory_space<vmem>>, vector<8x32xf32>,
    %73 = vector.extract_strided_slice %64 {offsets = [8, 0], sizes = [8, 32], strides = [1, 1]} : vector<32x32xf32> to vector<8x32xf32>
    %c32 = arith.constant 32 : index
    %c0_30 = arith.constant 0 : index
    %74 = vector.load %arg4[%c32, %c0_30] : memref<48x32xf32, #tpu.memory_space<vmem>>, vector<8x32xf32>
    tpu.vector_store %arg4[%c32, %c0_30], %73 {strides = array<i32>} : memref<48x32xf32, #tpu.memory_space<vmem>>, vector<8x32xf32>,
    %75 = vector.extract_strided_slice %64 {offsets = [24, 0], sizes = [8, 32], strides = [1, 1]} : vector<32x32xf32> to vector<8x32xf32>
    %c40_31 = arith.constant 40 : index
    %c0_32 = arith.constant 0 : index
    %76 = vector.load %arg4[%c40_31, %c0_32] : memref<48x32xf32, #tpu.memory_space<vmem>>, vector<8x32xf32>
    tpu.vector_store %arg4[%c40_31, %c0_32], %75 {strides = array<i32>} : memref<48x32xf32, #tpu.memory_space<vmem>>, vector<8x32xf32>,
    return
  }
}

</mosaic_0001>

<bundles_post_ra>
// kernel: tpu_custom_call.1
= control target key start
LH: loop header
LB: loop body
LE: loop exit
PB: predicated region body
PF: predicated region fallthrough
CT: control target
= control target key end

     0   :  { %vm69_vm0 = vcmask 1043456   ;;  %vm62_vm1 = vcmask 31744   ;;  %v341_v1 = vmov 0   ;;  %v36_v14 = vlaneseq  ;;  %s517_s3 = inlined_call_operand.vmem [shape: f32[88,32], index: 3, kind: input, shape index: {}]   ;;  %s518_s0 = inlined_call_operand.vmem [shape: f32[16,4], index: 0, kind: input, shape index: {}]   ;;  %s519_s2 = inlined_call_operand.vmem [shape: s32[16,1], index: 2, kind: input, shape index: {}]   ;;  %s520_s1 = inlined_call_operand.vmem [shape: s32[16,1], index: 1, kind: input, shape index: {}]   ;;  %s521_s4 = inlined_call_operand.vmem [shape: f32[48,32], index: 4, kind: output, shape index: {}]  }
   0x1   :  { %v17_v0 = vld [vmem:[%s517_s3] sm:$0xf]  ;;  %324 = vset.pattern.permute.xlu1 %v341_v1  ;;  %323 = vset.pattern.permute.xlu0 %v341_v1  ;;  %v33_v3 = vld [vmem:[%s519_s2 + $0x8] sm:$0xff]  ;;  %v20_v8 = vld [vmem:[%s517_s3 + $0x18] sm:$0xff]  ;;  %vm96_vm2 = vcmask 261120   ;;  %v342_v18 = vmov 0.0  }
   0x2   :  { %v28_v2 = vld [vmem:[%s518_s0] sm:$0xff]  ;;  %305 = vmatpush.msk.msra.mxu0 %vm69_vm0, %v17_v0  ;;  %v35_v4 = vadd.s32 8, %v33_v3  ;;  %v19_v9 = vld [vmem:[%s517_s3 + $0x10] sm:$0xff]  ;;  %v29_v10 = vld [vmem:[%s518_s0 + $0x8] sm:$0xff]  ;;  %v37_v15 = vand.u32 127, %v36_v14  ;;  %v343_v33 = vmov 32.0  }
   0x3   :  { %v32_v5 = vld [vmem:[%s519_s2] sm:$0xff]  ;;  %306 = vmatmul.msk.f32.vlgmr.msra.gmra.mxu0 %vm62_vm1, %v28_v2  ;;  %v31_v12 = vld [vmem:[%s520_s1 + $0x8] sm:$0xff]  ;;  %v23_v29 = vld [vmem:[%s517_s3 + $0x30] sm:$0xff]  ;;  %327 = vrcp.f32 %v343_v33 }
   0x4   :  { %v34_v6 = vadd.s32 8, %v32_v5  ;;  %v21_v7 = vld [vmem:[%s517_s3 + $0x20] sm:$0xff]  ;;  %48 = vperm.xlu1 %324, %v35_v4   ;;  %v18_v13 = vld [vmem:[%s517_s3 + $0x8] sm:$0xff]  ;;  %v24_v38 = vld [vmem:[%s517_s3 + $0x38] sm:$0xff] }
   0x5   :  { %313 = vmatpush.msra.mxu3 %v21_v7  ;;  %178 = vmatpush.msra.mxu1 %v21_v7  ;;  %v30_v11 = vld [vmem:[%s520_s1] sm:$0xff]  ;;  %v22_v21 = vld [vmem:[%s517_s3 + $0x28] sm:$0xff] }
   0x6   :  { %45 = vperm.xlu0 %323, %v34_v6   ;;  %312 = vmatpush.msra.mxu2 %v21_v7  ;;  %v25_v48 = vld [vmem:[%s517_s3 + $0x40] sm:$0xff] }
   0x7   :  { %315 = vmatpush.msra.mxu3 %v20_v8  ;;  %179 = vmatpush.msra.mxu1 %v20_v8 }
   0x8   :  { %314 = vmatpush.msra.mxu2 %v20_v8 }
   0x9   :  { %317 = vmatpush.msra.mxu3 %v19_v9  ;;  %180 = vmatpush.msra.mxu1 %v19_v9  ;;  %v328_v34 = vpop.eup %327 }
   0xa   :  { %316 = vmatpush.msra.mxu2 %v19_v9  ;;  %v104_v35 = vmul.f32 32.0, %v328_v34  ;;  %vm108_vm7 = vweird.f32 %v328_v34 }
   0xb   :  { %307 = vmatmul.msk.f32.gmra.mxu0 %vm62_vm1, %v29_v10  ;;  %319 = vmatpush.msra.mxu3 %v18_v13 }
   0xc   :  { %39 = vperm.xlu1 %324, %v30_v11   ;;  %181 = vmatpush.msra.mxu1 %v18_v13  ;;  %v105_v36 = vsub.f32 1.0, %v104_v35 }
   0xd   :  { %318 = vmatpush.msra.mxu2 %v18_v13 }
   0xe   :  { %42 = vperm.xlu0 %323, %v31_v12   ;;  %v106_v37 = vmul.f32 %v328_v34, %v105_v36 }
  0x10   :  { %v107_v39 = vadd.f32 %v328_v34, %v106_v37  ;;  %v470_v37 = vld [vmem:[%s517_s3 + $0x50] ss:$0 sm:$0xff] }
  0x12   :  { %v420_v46 = vsel %vm108_vm7, %v328_v34, %v107_v39  ;;  %v465_v34 = vld [vmem:[%s517_s3 + $0x48] ss:$0 sm:$0xff] }
  0x76   :  { %v49_v16 = vpop.permute.xlu1 %48 }
  0x77   :  { %vm53_vm4 = vcmp.eq.s32.totalorder %v37_v15, %v49_v16 }
  0x78   :  { %v46_v17 = vpop.permute.xlu0 %45  ;;  %v304_v25 = vsel %vm53_vm4, 1.0, %v342_v18 }
  0x79   :  { %vm52_vm3 = vcmp.eq.s32.totalorder %v37_v15, %v46_v17 }
  0x7a   :  { %v303_v19 = vsel %vm52_vm3, 1.0, %v342_v18 }
  0x7b   :  { %310 = vmatmul.msk.f32.vlgmr.msra.gmra.mxu3 %vm96_vm2, %v303_v19 }
  0x7e   :  { %v40_v20 = vpop.permute.xlu1 %39 }
  0x7f   :  { %vm50_vm5 = vcmp.eq.s32.totalorder %v37_v15, %v40_v20 }
  0x80   :  { %v43_v22 = vpop.permute.xlu0 %42  ;;  %v301_v23 = vsel %vm50_vm5, 1.0, %v342_v18  ;;  %v90_v24 = vpop.f32.mrf.mxu0 }
  0x81   :  { %vm51_vm6 = vcmp.eq.s32.totalorder %v37_v15, %v43_v22  ;;  %v91_v27 = vadd.f32 %v90_v24, %v22_v21  ;;  %308 = vmatmul.msk.f32.vlgmr.msra.gmra.mxu1 %vm96_vm2, %v301_v23 }
  0x82   :  { %v302_v26 = vsel %vm51_vm6, 1.0, %v342_v18 }
  0x83   :  { %309 = vmatmul.msk.f32.vlgmr.msra.gmra.mxu2 %vm96_vm2, %v302_v26  ;;  %311 = vmatmul.msk.f32.gmra.mxu3 %vm96_vm2, %v304_v25  ;;  %v97_v28 = vsel %vm96_vm2, %v91_v27, 0.0 }
  0x84   :  { %98 = vadd.xlane.f32.xlu2 %v97_v28 }
  0x88   :  { %v93_v30 = vpop.f32.mrf.mxu0 }
  0x89   :  { %v94_v31 = vadd.f32 %v93_v30, %v23_v29 }
  0x8b   :  { %v100_v32 = vsel %vm96_vm2, %v94_v31, 0.0 }
  0x8c   :  { %101 = vadd.xlane.f32.xlu2 %v100_v32 }
  0xf7   :  { %v99_v43 = vpop.xlane.xlu2 %98 }
  0xf8   :  { %v110_v49 = vmul.f32 %v420_v46, %v99_v43 }
  0xfa   :  { %v112_v54 = vsub.f32 %v91_v27, %v110_v49 }
  0xfc   :  { %v114_v59 = vmul.f32 %v112_v54, %v112_v54 }
  0xfe   :  { %v189_v40 = vpop.f32.mrf.mxu3  ;;  %v183_v42 = vpop.f32.mrf.mxu1  ;;  %v116_v61 = vsel %vm96_vm2, %v114_v59, 0.0 }
  0xff   :  { %v190_v41 = vadd.f32 %v189_v40, %v24_v38  ;;  %v184_v44 = vadd.f32 %v183_v42, %v22_v21  ;;  %v102_v57 = vpop.xlane.xlu2 %101 }
 0x100   :  { %v111_v58 = vmul.f32 %v420_v46, %v102_v57 }
 0x101   :  { %v201_v45 = vsel %vm96_vm2, %v190_v41, 0.0  ;;  %v195_v47 = vsel %vm96_vm2, %v184_v44, 0.0 }
 0x102   :  { %202 = vadd.xlane.f32.xlu2 %v201_v45  ;;  %196 = vadd.xlane.f32.xlu0 %v195_v47  ;;  %v430_v60 = vsub.f32 %v94_v31, %v111_v58 }
 0x104   :  { %v115_v62 = vmul.f32 %v430_v60, %v430_v60 }
 0x106   :  { %v186_v50 = vpop.f32.mrf.mxu2  ;;  %v192_v51 = vpop.f32.mrf.mxu3  ;;  %v119_v63 = vsel %vm96_vm2, %v115_v62, 0.0 }
 0x107   :  { %v187_v52 = vadd.f32 %v186_v50, %v23_v29  ;;  %v193_v53 = vadd.f32 %v192_v51, %v25_v48 }
 0x109   :  { %v198_v55 = vsel %vm96_vm2, %v187_v52, 0.0  ;;  %v204_v56 = vsel %vm96_vm2, %v193_v53, 0.0 }
 0x10a   :  { %199 = vadd.xlane.f32.xlu1 %v198_v55  ;;  %205 = vadd.xlane.f32.xlu2 %v204_v56 }
 0x112   :  { %117 = vadd.xlane.f32.xlu2 %v116_v61 }
 0x11a   :  { %120 = vadd.xlane.f32.xlu2 %v119_v63 }
 0x175   :  { %v203_v0 = vpop.xlane.xlu2 %202  ;;  %v197_v2 = vpop.xlane.xlu0 %196 }
 0x176   :  { %v209_v1 = vmul.f32 %v203_v0, %v420_v46  ;;  %v207_v3 = vmul.f32 %v197_v2, %v420_v46 }
 0x178   :  { %v438_v4 = vsub.f32 %v190_v41, %v209_v1  ;;  %v440_v5 = vsub.f32 %v184_v44, %v207_v3 }
 0x17a   :  { %v217_v6 = vmul.f32 %v438_v4, %v438_v4  ;;  %v215_v7 = vmul.f32 %v440_v5, %v440_v5 }
 0x17c   :  { %v225_v8 = vsel %vm96_vm2, %v217_v6, 0.0  ;;  %v219_v11 = vsel %vm96_vm2, %v215_v7, 0.0 }
 0x17d   :  { %v200_v9 = vpop.xlane.xlu1 %199  ;;  %226 = vadd.xlane.f32.xlu0 %v225_v8  ;;  %v206_v10 = vpop.xlane.xlu2 %205  ;;  %220 = vadd.xlane.f32.xlu2 %v219_v11 }
 0x17e   :  { %v208_v12 = vmul.f32 %v200_v9, %v420_v46  ;;  %v210_v13 = vmul.f32 %v206_v10, %v420_v46 }
 0x180   :  { %v450_v14 = vsub.f32 %v187_v52, %v208_v12  ;;  %v452_v15 = vsub.f32 %v193_v53, %v210_v13 }
 0x182   :  { %v218_v16 = vmul.f32 %v452_v15, %v452_v15  ;;  %v216_v17 = vmul.f32 %v450_v14, %v450_v14 }
 0x184   :  { %v228_v18 = vsel %vm96_vm2, %v218_v16, 0.0  ;;  %v222_v20 = vsel %vm96_vm2, %v216_v17, 0.0 }
 0x185   :  { %229 = vadd.xlane.f32.xlu1 %v228_v18  ;;  %v118_v19 = vpop.xlane.xlu2 %117  ;;  %223 = vadd.xlane.f32.xlu2 %v222_v20 }
 0x186   :  { %v122_v21 = vmul.f32 %v118_v19, %v420_v46 }
 0x188   :  { %v124_v22 = vadd.f32 1e-05, %v122_v21 }
 0x18a   :  { %329 = vrsqrt.f32 %v124_v22  ;;  %vm132_vm9 = vweird.f32 %v124_v22 }
 0x18d   :  { %v121_v23 = vpop.xlane.xlu2 %120 }
 0x18e   :  { %v123_v24 = vmul.f32 %v121_v23, %v420_v46 }
 0x190   :  { %v330_v25 = vpop.eup %329  ;;  %v125_v26 = vadd.f32 1e-05, %v123_v24 }
 0x191   :  { %v127_v27 = vmul.f32 %v330_v25, %v124_v22  ;;  %vm133_vm8 = vweird.f32 %v330_v25 }
 0x192   :  { %331 = vrsqrt.f32 %v125_v26  ;;  %vm134_vm10 = vmor %vm132_vm9, %vm133_vm8  ;;  %vm142_vm12 = vweird.f32 %v125_v26 }
 0x193   :  { %v128_v28 = vmul.f32 %v330_v25, %v127_v27 }
 0x195   :  { %v129_v29 = vmul.f32 0.5, %v128_v28 }
 0x197   :  { %v130_v30 = vsub.f32 1.5, %v129_v29 }
 0x198   :  { %v332_v31 = vpop.eup %331 }
 0x199   :  { %v131_v32 = vmul.f32 %v330_v25, %v130_v30  ;;  %v137_v33 = vmul.f32 %v332_v31, %v125_v26  ;;  %vm143_vm11 = vweird.f32 %v332_v31 }
 0x19a   :  { %vm144_vm13 = vmor %vm142_vm12, %vm143_vm11 }
 0x19b   :  { %v135_v35 = vsel %vm134_vm10, %v330_v25, %v131_v32  ;;  %v138_v36 = vmul.f32 %v332_v31, %v137_v33 }
 0x19c   :  { %v146_v38 = vmul.f32 %v135_v35, %v112_v54 }
 0x19d   :  { %v139_v39 = vmul.f32 0.5, %v138_v36 }
 0x19e   :  { %v149_v40 = vmul.f32 %v465_v34, %v146_v38 }
 0x19f   :  { %v140_v41 = vsub.f32 1.5, %v139_v39 }
 0x1a0   :  { %v152_v42 = vadd.f32 %v470_v37, %v149_v40 }
 0x1a1   :  { %v141_v43 = vmul.f32 %v332_v31, %v140_v41 }
 0x1a2   :  { %291 = vst.msk [vmem:[%s521_s4] sm:$0xff] %vm96_vm2, %v152_v42 }
 0x1a3   :  { %v145_v44 = vsel %vm144_vm13, %v332_v31, %v141_v43 }
 0x1a4   :  { %v147_v45 = vmul.f32 %v145_v44, %v430_v60 }
 0x1a6   :  { %v150_v47 = vmul.f32 %v465_v34, %v147_v45 }
 0x1a8   :  { %v153_v48 = vadd.f32 %v470_v37, %v150_v47 }
 0x1aa   :  { %294 = vst.msk [vmem:[%s521_s4 + $0x18] sm:$0xff] %vm96_vm2, %v153_v48 }
 0x1f0   :  { %v227_v49 = vpop.xlane.xlu0 %226  ;;  %v221_v51 = vpop.xlane.xlu2 %220 }
 0x1f1   :  { %v233_v50 = vmul.f32 %v227_v49, %v420_v46  ;;  %v231_v52 = vmul.f32 %v221_v51, %v420_v46 }
 0x1f3   :  { %v237_v53 = vadd.f32 1e-05, %v233_v50  ;;  %v235_v54 = vadd.f32 1e-05, %v231_v52 }
 0x1f5   :  { %333 = vrsqrt.f32 %v237_v53  ;;  %vm265_vm0 = vweird.f32 %v237_v53  ;;  %vm245_vm3 = vweird.f32 %v235_v54 }
 0x1f6   :  { %335 = vrsqrt.f32 %v235_v54 }
 0x1f8   :  { %v230_v55 = vpop.xlane.xlu1 %229  ;;  %v224_v57 = vpop.xlane.xlu2 %223 }
 0x1f9   :  { %v234_v56 = vmul.f32 %v230_v55, %v420_v46  ;;  %v232_v58 = vmul.f32 %v224_v57, %v420_v46 }
 0x1fb   :  { %v334_v59 = vpop.eup %333  ;;  %v238_v60 = vadd.f32 1e-05, %v234_v56  ;;  %v236_v63 = vadd.f32 1e-05, %v232_v58 }
 0x1fc   :  { %v336_v61 = vpop.eup %335  ;;  %v260_v62 = vmul.f32 %v334_v59, %v237_v53  ;;  %vm266_vm14 = vweird.f32 %v334_v59 }
 0x1fd   :  { %v240_v0 = vmul.f32 %v336_v61, %v235_v54  ;;  %337 = vrsqrt.f32 %v238_v60  ;;  %vm246_vm15 = vweird.f32 %v336_v61  ;;  %vm267_vm1 = vmor %vm265_vm0, %vm266_vm14  ;;  %vm275_vm7 = vweird.f32 %v238_v60 }
 0x1fe   :  { %v261_v1 = vmul.f32 %v334_v59, %v260_v62  ;;  %339 = vrsqrt.f32 %v236_v63  ;;  %vm247_vm4 = vmor %vm245_vm3, %vm246_vm15  ;;  %vm255_vm9 = vweird.f32 %v236_v63 }
 0x1ff   :  { %v241_v2 = vmul.f32 %v336_v61, %v240_v0 }
 0x200   :  { %v262_v3 = vmul.f32 0.5, %v261_v1 }
 0x201   :  { %v242_v6 = vmul.f32 0.5, %v241_v2 }
 0x202   :  { %v263_v7 = vsub.f32 1.5, %v262_v3 }
 0x203   :  { %v338_v8 = vpop.eup %337  ;;  %v243_v9 = vsub.f32 1.5, %v242_v6 }
 0x204   :  { %v340_v10 = vpop.eup %339  ;;  %v264_v11 = vmul.f32 %v334_v59, %v263_v7  ;;  %v270_v46 = vmul.f32 %v338_v8, %v238_v60  ;;  %vm276_vm5 = vweird.f32 %v338_v8 }
 0x205   :  { %v244_v12 = vmul.f32 %v336_v61, %v243_v9  ;;  %v250_v13 = vmul.f32 %v340_v10, %v236_v63  ;;  %vm256_vm6 = vweird.f32 %v340_v10  ;;  %vm277_vm8 = vmor %vm275_vm7, %vm276_vm5 }
 0x206   :  { %v268_v16 = vsel %vm267_vm1, %v334_v59, %v264_v11  ;;  %v271_v17 = vmul.f32 %v338_v8, %v270_v46  ;;  %vm257_vm10 = vmor %vm255_vm9, %vm256_vm6 }
 0x207   :  { %v281_v18 = vmul.f32 %v268_v16, %v438_v4  ;;  %v248_v19 = vsel %vm247_vm4, %v336_v61, %v244_v12  ;;  %v251_v20 = vmul.f32 %v340_v10, %v250_v13 }
 0x208   :  { %v279_v21 = vmul.f32 %v248_v19, %v440_v5  ;;  %v272_v22 = vmul.f32 0.5, %v271_v17 }
 0x209   :  { %v285_v23 = vmul.f32 %v465_v34, %v281_v18  ;;  %v252_v24 = vmul.f32 0.5, %v251_v20 }
 0x20a   :  { %v283_v25 = vmul.f32 %v465_v34, %v279_v21  ;;  %v273_v26 = vsub.f32 1.5, %v272_v22 }
 0x20b   :  { %v289_v27 = vadd.f32 %v470_v37, %v285_v23  ;;  %v253_v28 = vsub.f32 1.5, %v252_v24 }
 0x20c   :  { %v287_v29 = vadd.f32 %v470_v37, %v283_v25  ;;  %v274_v30 = vmul.f32 %v338_v8, %v273_v26 }
 0x20d   :  { %293 = vst.msk [vmem:[%s521_s4 + $0x10] sm:$0xff] %vm96_vm2, %v289_v27  ;;  %v254_v4 = vmul.f32 %v340_v10, %v253_v28 }
 0x20e   :  { %292 = vst.msk [vmem:[%s521_s4 + $0x8] sm:$0xff] %vm96_vm2, %v287_v29  ;;  %v278_v5 = vsel %vm277_vm8, %v338_v8, %v274_v30 }
 0x20f   :  { %v282_v31 = vmul.f32 %v278_v5, %v452_v15  ;;  %v258_v32 = vsel %vm257_vm10, %v340_v10, %v254_v4 }
 0x210   :  { %v280_v33 = vmul.f32 %v258_v32, %v450_v14 }
 0x211   :  { %v286_v35 = vmul.f32 %v465_v34, %v282_v31 }
 0x212   :  { %v284_v36 = vmul.f32 %v465_v34, %v280_v33 }
 0x213   :  { %v290_v38 = vadd.f32 %v470_v37, %v286_v35 }
 0x214   :  { %v288_v39 = vadd.f32 %v470_v37, %v284_v36 }
 0x215   :  { %296 = vst.msk [vmem:[%s521_s4 + $0x28] sm:$0xff] %vm96_vm2, %v290_v38 }
 0x216   :  { %295 = vst.msk [vmem:[%s521_s4 + $0x20] sm:$0xff] %vm96_vm2, %v288_v39 }

</bundles_post_ra>
